<compile_context>
chip_gen: v5e
topology: v5e:2x2
jax: 0.10.0
libtpu: 0.0.40
codegen_flags: <defaults>
</compile_context>

<pallas_src>
import functools
import math

import jax
import jax.numpy as jnp
from jax.experimental import pallas as pl
from jax.experimental.pallas import tpu as pltpu


# --------------------------------------------------------------------------------------
# in-kernel helpers
# --------------------------------------------------------------------------------------

def _layer_norm(v, w, b):
  # fp32 LayerNorm (matches the torch LayerNorm subclass that casts inputs to float),
  # eps = 1e-5, affine params broadcast from (1, W).
  mu = jnp.mean(v, axis=-1, keepdims=True)
  var = jnp.mean(jnp.square(v - mu), axis=-1, keepdims=True)
  return (v - mu) * jax.lax.rsqrt(var + 1e-5) * w + b


# --------------------------------------------------------------------------------------
# stage 1: fused LayerNorm_1 + Q/K/V projections (computed once per token)
# --------------------------------------------------------------------------------------

def _qkv_projection_kernel(x_ref, ln1_w_ref, ln1_b_ref, wq_ref, wk_ref, wv_ref,
                           q_ref, k_ref, v_ref):
  f32 = jnp.float32
  bf16 = jnp.bfloat16
  x = x_ref[0].astype(f32)                                    # (TN, W)
  ln = _layer_norm(x, ln1_w_ref[...], ln1_b_ref[...]).astype(bf16)
  # wq already carries the 1/sqrt(D) attention scale (folded in prepare_params).
  q_ref[0] = jnp.dot(ln, wq_ref[...], preferred_element_type=f32).astype(q_ref.dtype)
  k_ref[0] = jnp.dot(ln, wk_ref[...], preferred_element_type=f32).astype(k_ref.dtype)
  v_ref[0] = jnp.dot(ln, wv_ref[...], preferred_element_type=f32).astype(v_ref.dtype)


# --------------------------------------------------------------------------------------
# stage 2: per-head online-softmax attention + output projection + MLP (fused)
# --------------------------------------------------------------------------------------

def _attention_mlp_kernel(x_ref, q_ref, k_ref, v_ref,
                          wo_ref, bo_ref, ln2_w_ref, ln2_b_ref,
                          w1_ref, b1_ref, w2_ref, b2_ref,
                          o_ref, *, heads, kv_chunk):
  f32 = jnp.float32
  bf16 = jnp.bfloat16

  xq = x_ref[0].astype(f32)                                   # (TN, W) residual stream
  tn, w = xq.shape
  d = w // heads
  n = k_ref.shape[1]
  n_chunks = n // kv_chunk
  inv_sqrt2 = 1.0 / math.sqrt(2.0)

  # --- attention: per head, flash-style online softmax over KV chunks ---
  ctx_heads = []
  for h in range(heads):
    hd0 = h * d
    q_h = q_ref[0, :, hd0:hd0 + d]                            # (TN, D) bf16, pre-scaled
    m_i = jnp.full((tn, 1), -jnp.inf, f32)
    l_i = jnp.zeros((tn, 1), f32)
    acc = jnp.zeros((tn, d), f32)
    for c in range(n_chunks):
      r0 = c * kv_chunk
      k_hc = k_ref[0, r0:r0 + kv_chunk, hd0:hd0 + d]          # (C, D) bf16
      v_hc = v_ref[0, r0:r0 + kv_chunk, hd0:hd0 + d]          # (C, D) bf16
      s = jnp.einsum('qd,kd->qk', q_h, k_hc,
                     preferred_element_type=f32)              # (TN, C) fp32
      m_new = jnp.maximum(m_i, jnp.max(s, axis=-1, keepdims=True))
      alpha = jnp.exp(m_i - m_new)
      p = jnp.exp(s - m_new)
      l_i = alpha * l_i + jnp.sum(p, axis=-1, keepdims=True)
      acc = alpha * acc + jnp.dot(p.astype(bf16), v_hc,
                                  preferred_element_type=f32)
      m_i = m_new
    # approx reciprocal: EUP slot, rows sum to 1 +/- ~1e-3 (documented tolerance trade).
    ctx_heads.append(acc * pl.reciprocal(l_i, approx=True))

  # merge heads once along lanes, then a single full-width output projection.
  ctx = jnp.concatenate(ctx_heads, axis=-1).astype(bf16)      # (TN, W)
  attn = jnp.dot(ctx, wo_ref[...], preferred_element_type=f32) + bo_ref[...]
  x1 = xq + attn                                              # fp32 residual

  # --- MLP branch: Linear -> exact GELU (erf, torch default) -> Linear ---
  ln2 = _layer_norm(x1, ln2_w_ref[...], ln2_b_ref[...]).astype(bf16)
  h1 = jnp.dot(ln2, w1_ref[...], preferred_element_type=f32) + b1_ref[...]
  g = 0.5 * h1 * (1.0 + jax.lax.erf(h1 * inv_sqrt2))
  mlp = jnp.dot(g.astype(bf16), w2_ref[...], preferred_element_type=f32) + b2_ref[...]

  o_ref[0] = (x1 + mlp).astype(o_ref.dtype)


# --------------------------------------------------------------------------------------
# wrapper
# --------------------------------------------------------------------------------------

def _pick_divisor(n, target, step):
  """Largest multiple-of-`step` divisor of n that is <= target (else n)."""
  if n <= target:
    return n
  cand = target - (target % step)
  while cand >= step:
    if n % cand == 0:
      return cand
    cand -= step
  return n


def _pick_seq_tile(n, target=256):
  if n % 8 != 0:
    return n
  return _pick_divisor(n, target, 8)


def _pick_kv_chunk(n, target=512):
  if n % 128 == 0:
    return _pick_divisor(n, target, 128)
  if n % 8 == 0:
    return _pick_divisor(n, target, 8)
  return n


def _vmem_limit_bytes(need_bytes):
  """Generation-aware scoped-VMEM budget: ~2x headroom, capped at 80% of physical."""
  try:
    cap = int(pltpu.get_tpu_info().vmem_capacity_bytes)
  except Exception:
    cap = 64 * 1024 * 1024            # conservative fallback: v7x has the smallest VMEM
  hi = max(int(0.8 * cap), 16 * 1024 * 1024)
  want = max(int(2 * need_bytes), 32 * 1024 * 1024)
  return min(want, hi)


def _block_spec(shape, index_map, buffers=None):
  """BlockSpec with an optional explicit buffer count (graceful fallback if the
  installed jax has no pipeline_mode support)."""
  if buffers is not None and hasattr(pl, "Buffered"):
    try:
      return pl.BlockSpec(shape, index_map, pipeline_mode=pl.Buffered(buffers))
    except TypeError:
      pass
  return pl.BlockSpec(shape, index_map)


def prepare_params(params, heads):
  """One-time parameter prep: bf16 MXU operands, attention scale folded into wq.
  LayerNorm params and biases stay fp32 (they are added in fp32 inside the kernels)."""
  width = params["wq"].shape[0]
  scale = 1.0 / math.sqrt(width // heads)
  bf16 = jnp.bfloat16
  prep = dict(params)
  prep["wq"] = (params["wq"] * scale).astype(bf16)
  prep["wk"] = params["wk"].astype(bf16)
  prep["wv"] = params["wv"].astype(bf16)
  prep["wo"] = params["wo"].astype(bf16)
  prep["w1"] = params["w1"].astype(bf16)
  prep["w2"] = params["w2"].astype(bf16)
  return prep


def residual_attention_block(x, prep, heads, *, seq_tile=None, kv_chunk=None):
  B, N, W = x.shape
  assert W % heads == 0, "width must be divisible by heads"
  inner = prep["w1"].shape[1]
  assert inner == 4 * W, "FeedForward uses mult=4"

  if (seq_tile is None or N % seq_tile != 0
      or (seq_tile % 8 != 0 and seq_tile != N)):
    seq_tile = _pick_seq_tile(N)
  TN = seq_tile
  NT = N // TN
  if kv_chunk is None or N % kv_chunk != 0:
    kv_chunk = _pick_kv_chunk(N)
  KC = kv_chunk

  bf16 = jnp.bfloat16
  xb = x.dtype.itemsize

  tile_spec = pl.BlockSpec((1, TN, W), lambda b, i: (b, i, 0))

  def const_spec(shape):
    nd = len(shape)
    return _block_spec(shape, lambda b, i, _nd=nd: (0,) * _nd, buffers=1)

  # ---- stage 1: Q/K/V projection (K/V computed once per token) ----
  need1 = (2 * TN * W * xb                  # x tile (double-buffered)
           + 3 * 2 * TN * W * 2             # q/k/v output tiles (double-buffered bf16)
           + 3 * W * W * 2                  # wq/wk/wv (single-buffered bf16)
           + 6 * TN * W * 4)                # fp32 LayerNorm intermediates (headroom)
  qkv_shape = jax.ShapeDtypeStruct((B, N, W), bf16)
  q, k, v = pl.pallas_call(
      _qkv_projection_kernel,
      out_shape=(qkv_shape, qkv_shape, qkv_shape),
      grid_spec=pltpu.PrefetchScalarGridSpec(
          num_scalar_prefetch=0,
          grid=(B, NT),
          in_specs=[tile_spec,
                    const_spec((1, W)), const_spec((1, W)),
                    const_spec((W, W)), const_spec((W, W)), const_spec((W, W))],
          out_specs=[tile_spec, tile_spec, tile_spec]),
      compiler_params=pltpu.CompilerParams(
          dimension_semantics=("parallel", "parallel"),
          vmem_limit_bytes=_vmem_limit_bytes(need1)),
  )(x, prep["ln1_w"], prep["ln1_b"], prep["wq"], prep["wk"], prep["wv"])

  # ---- stage 2: attention + output projection + MLP ----
  # full-sequence K/V blocks only change with b -> single-buffer them (saves VMEM).
  seq_spec = _block_spec((1, N, W), lambda b, i: (b, 0, 0), buffers=1)
  need2 = (2 * TN * W * xb + 2 * TN * W * 2 + 2 * TN * W * xb  # x, q, out tiles
           + 2 * N * W * 2                                     # K and V (single-buffered)
           + (W * W + 2 * W * inner) * 2                       # wo, w1, w2 (bf16, single)
           + 2 * TN * inner * 4                                # MLP hidden + GELU (fp32)
           + 3 * TN * KC * 4                                   # per-head score scratch
           + 7 * TN * W * 4)                                   # fp32 residual/LN/ctx slabs
  kernel2 = functools.partial(_attention_mlp_kernel, heads=heads, kv_chunk=KC)
  return pl.pallas_call(
      kernel2,
      out_shape=jax.ShapeDtypeStruct((B, N, W), x.dtype),
      grid_spec=pltpu.PrefetchScalarGridSpec(
          num_scalar_prefetch=0,
          grid=(B, NT),
          in_specs=[tile_spec,                                 # x (residual input)
                    tile_spec,                                 # q (bf16, pre-scaled)
                    seq_spec, seq_spec,                        # k, v (bf16, full sequence)
                    const_spec((W, W)), const_spec((1, W)),    # wo, bo
                    const_spec((1, W)), const_spec((1, W)),    # ln2 gamma / beta
                    const_spec((W, inner)), const_spec((1, inner)),   # w1, b1
                    const_spec((inner, W)), const_spec((1, W))],      # w2, b2
          out_specs=tile_spec),
      compiler_params=pltpu.CompilerParams(
          dimension_semantics=("parallel", "parallel"),
          vmem_limit_bytes=_vmem_limit_bytes(need2)),
  )(x, q, k, v, prep["wo"], prep["bo"], prep["ln2_w"], prep["ln2_b"],
    prep["w1"], prep["b1"], prep["w2"], prep["b2"])


# --------------------------------------------------------------------------------------
# parameters & pure-JAX reference (sanity check only)
# --------------------------------------------------------------------------------------

def init_params(key, width):
  inner = 4 * width
  ks = jax.random.split(key, 8)
  s = 0.02
  return {
      # LayerNorm 1
      "ln1_w": jnp.ones((1, width), jnp.float32),
      "ln1_b": jnp.zeros((1, width), jnp.float32),
      # attention (weights stored as (in, out) so kernels do x @ W); bias-free q/k/v
      "wq": s * jax.random.normal(ks[0], (width, width), jnp.float32),
      "wk": s * jax.random.normal(ks[1], (width, width), jnp.float32),
      "wv": s * jax.random.normal(ks[2], (width, width), jnp.float32),
      "wo": s * jax.random.normal(ks[3], (width, width), jnp.float32),
      "bo": s * jax.random.normal(ks[4], (1, width), jnp.float32),
      # LayerNorm 2
      "ln2_w": jnp.ones((1, width), jnp.float32),
      "ln2_b": jnp.zeros((1, width), jnp.float32),
      # MLP (FeedForward, mult=4, no GLU; Dropout(p=0.0) is an identity)
      "w1": s * jax.random.normal(ks[5], (width, inner), jnp.float32),
      "b1": jnp.zeros((1, inner), jnp.float32),
      "w2": s * jax.random.normal(ks[6], (inner, width), jnp.float32),
      "b2": jnp.zeros((1, width), jnp.float32),
  }


def _reference_forward(x, params, heads):
  """Pure-JAX fp32 reference mirroring the PyTorch module."""
  xf = x.astype(jnp.float32)
  B, N, W = xf.shape
  D = W // heads

  def ln(v, w, b):
    mu = jnp.mean(v, axis=-1, keepdims=True)
    var = jnp.mean((v - mu) ** 2, axis=-1, keepdims=True)
    return (v - mu) * jax.lax.rsqrt(var + 1e-5) * w + b

  h = ln(xf, params["ln1_w"][0], params["ln1_b"][0])
  q = (h @ params["wq"]).reshape(B, N, heads, D)
  k = (h @ params["wk"]).reshape(B, N, heads, D)
  v = (h @ params["wv"]).reshape(B, N, heads, D)
  s = jnp.einsum('bnhd,bmhd->bhnm', q, k) / math.sqrt(D)
  p = jax.nn.softmax(s, axis=-1)
  ctx = jnp.einsum('bhnm,bmhd->bnhd', p, v).reshape(B, N, W)
  attn = ctx @ params["wo"] + params["bo"][0]
  x1 = xf + attn
  h2 = ln(x1, params["ln2_w"][0], params["ln2_b"][0])
  m = h2 @ params["w1"] + params["b1"][0]
  m = 0.5 * m * (1.0 + jax.lax.erf(m / math.sqrt(2.0)))
  m = m @ params["w2"] + params["b2"][0]
  return (x1 + m).astype(x.dtype)


if __name__ == "__main__":
  B, N, W, H = 2, 16, 32, 4   # batch, tokens, width (= context_dim), heads
  key = jax.random.PRNGKey(0)
  kx, kp = jax.random.split(key)
  x = jax.random.normal(kx, (B, N, W), jnp.float32)
  params = init_params(kp, W)
  prep = prepare_params(params, H)

  # seq_tile=8 -> 2 query tiles; kv_chunk=8 -> 2 KV chunks (exercises the online softmax).
  out = residual_attention_block(x, prep, H, seq_tile=8, kv_chunk=8)
  out = jax.block_until_ready(out)
  assert out.shape == (B, N, W) and out.dtype == x.dtype

  ref = _reference_forward(x, params, H)
  max_err = float(jnp.max(jnp.abs(out.astype(jnp.float32) - ref.astype(jnp.float32))))
  assert max_err < 2e-2, f"kernel/reference mismatch: max abs err {max_err}"
  print("KERNEL_OK")
</pallas_src>

<mosaic_0001>
module attributes {stable_mosaic.version = 11 : i64} {
  func.func @_qkv_projection_kernel(%arg0: i32, %arg1: i32, %arg2: memref<1x8x32xf32, #tpu.memory_space<vmem>>, %arg3: memref<1x32xf32, #tpu.memory_space<vmem>>, %arg4: memref<1x32xf32, #tpu.memory_space<vmem>>, %arg5: memref<32x32xbf16, #tpu.memory_space<vmem>>, %arg6: memref<32x32xbf16, #tpu.memory_space<vmem>>, %arg7: memref<32x32xbf16, #tpu.memory_space<vmem>>, %arg8: memref<1x8x32xbf16, #tpu.memory_space<vmem>>, %arg9: memref<1x8x32xbf16, #tpu.memory_space<vmem>>, %arg10: memref<1x8x32xbf16, #tpu.memory_space<vmem>>) attributes {dimension_semantics = [#tpu.dimension_semantics<parallel>, #tpu.dimension_semantics<parallel>], iteration_bounds = array<i64: 2, 2>, scalar_prefetch = 0 : i64, scratch_operands = 0 : i64, tpu.core_type = #tpu.core_type<tc>, window_params = [{transform_indices = @transform_0, window_bounds = array<i64: 1, 8, 32>}, {pipeline_mode = #tpu.pipeline_mode<synchronous>, transform_indices = @transform_1, window_bounds = array<i64: 1, 32>}, {pipeline_mode = #tpu.pipeline_mode<synchronous>, transform_indices = @transform_2, window_bounds = array<i64: 1, 32>}, {pipeline_mode = #tpu.pipeline_mode<synchronous>, transform_indices = @transform_3, window_bounds = array<i64: 32, 32>}, {pipeline_mode = #tpu.pipeline_mode<synchronous>, transform_indices = @transform_4, window_bounds = array<i64: 32, 32>}, {pipeline_mode = #tpu.pipeline_mode<synchronous>, transform_indices = @transform_5, window_bounds = array<i64: 32, 32>}, {transform_indices = @transform_6, window_bounds = array<i64: 1, 8, 32>}, {transform_indices = @transform_7, window_bounds = array<i64: 1, 8, 32>}, {transform_indices = @transform_8, window_bounds = array<i64: 1, 8, 32>}]} {
    %c0 = arith.constant 0 : index
    %c0_0 = arith.constant 0 : index
    %c0_1 = arith.constant 0 : index
    %0 = vector.load %arg2[%c0, %c0_0, %c0_1] : memref<1x8x32xf32, #tpu.memory_space<vmem>>, vector<1x8x32xf32>
    %1 = vector.shape_cast %0 : vector<1x8x32xf32> to vector<8x32xf32>
    %c0_2 = arith.constant 0 : index
    %c0_3 = arith.constant 0 : index
    %2 = vector.load %arg3[%c0_2, %c0_3] : memref<1x32xf32, #tpu.memory_space<vmem>>, vector<1x32xf32>
    %c0_4 = arith.constant 0 : index
    %c0_5 = arith.constant 0 : index
    %3 = vector.load %arg4[%c0_4, %c0_5] : memref<1x32xf32, #tpu.memory_space<vmem>>, vector<1x32xf32>
    %cst = arith.constant dense<0.000000e+00> : vector<8xf32>
    %4 = vector.multi_reduction <add>, %1, %cst [1] : vector<8x32xf32> to vector<8xf32>
    %5 = vector.shape_cast %4 : vector<8xf32> to vector<8x1xf32>
    %cst_6 = arith.constant 3.200000e+01 : f32
    %6 = vector.broadcast %cst_6 : f32 to vector<8x1xf32>
    %7 = arith.divf %5, %6 : vector<8x1xf32>
    %8 = vector.broadcast %7 : vector<8x1xf32> to vector<8x32xf32>
    %9 = arith.subf %1, %8 : vector<8x32xf32>
    %10 = arith.mulf %9, %9 : vector<8x32xf32>
    %cst_7 = arith.constant dense<0.000000e+00> : vector<8xf32>
    %11 = vector.multi_reduction <add>, %10, %cst_7 [1] : vector<8x32xf32> to vector<8xf32>
    %12 = vector.shape_cast %11 : vector<8xf32> to vector<8x1xf32>
    %cst_8 = arith.constant 3.200000e+01 : f32
    %13 = vector.broadcast %cst_8 : f32 to vector<8x1xf32>
    %14 = arith.divf %12, %13 : vector<8x1xf32>
    %15 = vector.broadcast %7 : vector<8x1xf32> to vector<8x32xf32>
    %16 = arith.subf %1, %15 : vector<8x32xf32>
    %cst_9 = arith.constant 9.99999974E-6 : f32
    %17 = vector.broadcast %cst_9 : f32 to vector<8x1xf32>
    %18 = arith.addf %14, %17 : vector<8x1xf32>
    %19 = math.rsqrt %18 : vector<8x1xf32>
    %20 = vector.broadcast %19 : vector<8x1xf32> to vector<8x32xf32>
    %21 = arith.mulf %16, %20 : vector<8x32xf32>
    %22 = vector.broadcast %2 : vector<1x32xf32> to vector<8x32xf32>
    %23 = arith.mulf %21, %22 : vector<8x32xf32>
    %24 = vector.broadcast %3 : vector<1x32xf32> to vector<8x32xf32>
    %25 = arith.addf %23, %24 : vector<8x32xf32>
    %26 = arith.truncf %25 : vector<8x32xf32> to vector<8x32xbf16>
    %c0_10 = arith.constant 0 : index
    %c0_11 = arith.constant 0 : index
    %27 = vector.load %arg5[%c0_10, %c0_11] : memref<32x32xbf16, #tpu.memory_space<vmem>>, vector<32x32xbf16>
    %cst_12 = arith.constant dense<0.000000e+00> : vector<8x32xf32>
    %28 = tpu.matmul %26, %27, %cst_12 {dimension_numbers = #tpu.dot_dimension_numbers<[1], [0], [0], [1], [0, 0, 1, 1], [], []>} : vector<8x32xbf16>, vector<32x32xbf16>, vector<8x32xf32> -> vector<8x32xf32>
    %29 = arith.truncf %28 : vector<8x32xf32> to vector<8x32xbf16>
    %c0_13 = arith.constant 0 : index
    %c0_14 = arith.constant 0 : index
    %c0_15 = arith.constant 0 : index
    %30 = vector.load %arg8[%c0_13, %c0_14, %c0_15] : memref<1x8x32xbf16, #tpu.memory_space<vmem>>, vector<1x8x32xbf16>
    %31 = vector.shape_cast %30 : vector<1x8x32xbf16> to vector<8x32xbf16>
    %32 = vector.shape_cast %29 : vector<8x32xbf16> to vector<1x8x32xbf16>
    tpu.vector_store %arg8[%c0_13, %c0_14, %c0_15], %32 {strides = array<i32>} : memref<1x8x32xbf16, #tpu.memory_space<vmem>>, vector<1x8x32xbf16>,
    %c0_16 = arith.constant 0 : index
    %c0_17 = arith.constant 0 : index
    %33 = vector.load %arg6[%c0_16, %c0_17] : memref<32x32xbf16, #tpu.memory_space<vmem>>, vector<32x32xbf16>
    %cst_18 = arith.constant dense<0.000000e+00> : vector<8x32xf32>
    %34 = tpu.matmul %26, %33, %cst_18 {dimension_numbers = #tpu.dot_dimension_numbers<[1], [0], [0], [1], [0, 0, 1, 1], [], []>} : vector<8x32xbf16>, vector<32x32xbf16>, vector<8x32xf32> -> vector<8x32xf32>
    %35 = arith.truncf %34 : vector<8x32xf32> to vector<8x32xbf16>
    %c0_19 = arith.constant 0 : index
    %c0_20 = arith.constant 0 : index
    %c0_21 = arith.constant 0 : index
    %36 = vector.load %arg9[%c0_19, %c0_20, %c0_21] : memref<1x8x32xbf16, #tpu.memory_space<vmem>>, vector<1x8x32xbf16>
    %37 = vector.shape_cast %36 : vector<1x8x32xbf16> to vector<8x32xbf16>
    %38 = vector.shape_cast %35 : vector<8x32xbf16> to vector<1x8x32xbf16>
    tpu.vector_store %arg9[%c0_19, %c0_20, %c0_21], %38 {strides = array<i32>} : memref<1x8x32xbf16, #tpu.memory_space<vmem>>, vector<1x8x32xbf16>,
    %c0_22 = arith.constant 0 : index
    %c0_23 = arith.constant 0 : index
    %39 = vector.load %arg7[%c0_22, %c0_23] : memref<32x32xbf16, #tpu.memory_space<vmem>>, vector<32x32xbf16>
    %cst_24 = arith.constant dense<0.000000e+00> : vector<8x32xf32>
    %40 = tpu.matmul %26, %39, %cst_24 {dimension_numbers = #tpu.dot_dimension_numbers<[1], [0], [0], [1], [0, 0, 1, 1], [], []>} : vector<8x32xbf16>, vector<32x32xbf16>, vector<8x32xf32> -> vector<8x32xf32>
    %41 = arith.truncf %40 : vector<8x32xf32> to vector<8x32xbf16>
    %c0_25 = arith.constant 0 : index
    %c0_26 = arith.constant 0 : index
    %c0_27 = arith.constant 0 : index
    %42 = vector.load %arg10[%c0_25, %c0_26, %c0_27] : memref<1x8x32xbf16, #tpu.memory_space<vmem>>, vector<1x8x32xbf16>
    %43 = vector.shape_cast %42 : vector<1x8x32xbf16> to vector<8x32xbf16>
    %44 = vector.shape_cast %41 : vector<8x32xbf16> to vector<1x8x32xbf16>
    tpu.vector_store %arg10[%c0_25, %c0_26, %c0_27], %44 {strides = array<i32>} : memref<1x8x32xbf16, #tpu.memory_space<vmem>>, vector<1x8x32xbf16>,
    return
  }
  func.func @transform_0(%arg0: i32, %arg1: i32) -> (i32, i32, i32) {
    %c0_i32 = arith.constant 0 : i32
    %c0_i32_0 = arith.constant 0 : i32
    return %arg0, %arg1, %c0_i32 : i32, i32, i32
  }
  func.func @transform_1(%arg0: i32, %arg1: i32) -> (i32, i32) {
    %c0_i32 = arith.constant 0 : i32
    %c0_i32_0 = arith.constant 0 : i32
    %c0_i32_1 = arith.constant 0 : i32
    return %c0_i32, %c0_i32_0 : i32, i32
  }
  func.func @transform_2(%arg0: i32, %arg1: i32) -> (i32, i32) {
    %c0_i32 = arith.constant 0 : i32
    %c0_i32_0 = arith.constant 0 : i32
    %c0_i32_1 = arith.constant 0 : i32
    return %c0_i32, %c0_i32_0 : i32, i32
  }
  func.func @transform_3(%arg0: i32, %arg1: i32) -> (i32, i32) {
    %c0_i32 = arith.constant 0 : i32
    %c0_i32_0 = arith.constant 0 : i32
    %c0_i32_1 = arith.constant 0 : i32
    return %c0_i32, %c0_i32_0 : i32, i32
  }
  func.func @transform_4(%arg0: i32, %arg1: i32) -> (i32, i32) {
    %c0_i32 = arith.constant 0 : i32
    %c0_i32_0 = arith.constant 0 : i32
    %c0_i32_1 = arith.constant 0 : i32
    return %c0_i32, %c0_i32_0 : i32, i32
  }
  func.func @transform_5(%arg0: i32, %arg1: i32) -> (i32, i32) {
    %c0_i32 = arith.constant 0 : i32
    %c0_i32_0 = arith.constant 0 : i32
    %c0_i32_1 = arith.constant 0 : i32
    return %c0_i32, %c0_i32_0 : i32, i32
  }
  func.func @transform_6(%arg0: i32, %arg1: i32) -> (i32, i32, i32) {
    %c0_i32 = arith.constant 0 : i32
    %c0_i32_0 = arith.constant 0 : i32
    return %arg0, %arg1, %c0_i32 : i32, i32, i32
  }
  func.func @transform_7(%arg0: i32, %arg1: i32) -> (i32, i32, i32) {
    %c0_i32 = arith.constant 0 : i32
    %c0_i32_0 = arith.constant 0 : i32
    return %arg0, %arg1, %c0_i32 : i32, i32, i32
  }
  func.func @transform_8(%arg0: i32, %arg1: i32) -> (i32, i32, i32) {
    %c0_i32 = arith.constant 0 : i32
    %c0_i32_0 = arith.constant 0 : i32
    return %arg0, %arg1, %c0_i32 : i32, i32, i32
  }
}

</mosaic_0001>

<bundles_post_ra>
// kernel: tpu_custom_call.1
= control target key start
LH: loop header
LB: loop body
LE: loop exit
PB: predicated region body
PF: predicated region fallthrough
CT: control target
= control target key end

     0   :  { %s1667_s0 = inlined_call_operand.hbm [shape: f32[2,16,32], index: 0, kind: input, shape index: {}]   ;;  %s1668_s1 = inlined_call_operand.hbm [shape: f32[1,32], index: 1, kind: input, shape index: {}]   ;;  %s1669_s2 = inlined_call_operand.vmem [shape: f32[1,32], index: 2, kind: input, shape index: {}]   ;;  %s1670_s3 = inlined_call_operand.hbm [shape: bf16[32,32], index: 3, kind: input, shape index: {}]   ;;  %s1671_s4 = inlined_call_operand.hbm [shape: bf16[32,32], index: 4, kind: input, shape index: {}]   ;;  %s1672_s5 = inlined_call_operand.hbm [shape: bf16[32,32], index: 5, kind: input, shape index: {}]   ;;  %s1673_s6 = inlined_call_operand.hbm [shape: bf16[2,16,32], index: 6, kind: output, shape index: {0}]   ;;  %s1674_s7 = inlined_call_operand.hbm [shape: bf16[2,16,32], index: 7, kind: output, shape index: {1}]   ;;  %s1675_s8 = inlined_call_operand.hbm [shape: bf16[2,16,32], index: 8, kind: output, shape index: {2}]  }
   0x1   :  { %1685 = sst [smem:[#allocation25_spill]] %s1668_s1 }
   0x2   :  { %1686 = sst [smem:[#allocation26_spill]] %s1670_s3 }
   0x3   :  { %1687 = sst [smem:[#allocation27_spill]] %s1671_s4 }
   0x4   :  { %1688 = sst [smem:[#allocation28_spill]] %s1672_s5 }
   0x5   :  { %1689 = sst [smem:[#allocation29_spill]] %s1675_s8 }
   0x6   :  { %14 = vsyncpa [#allocation3], 0 }
   0x7   :  { %16 = vsyncpa [#allocation3 + $0x1], 0 }
   0x8   :  { %17 = vsyncpa [#allocation6], 0 }
   0x9   :  { %18 = vsyncpa [#allocation9], 0 }
   0xa   :  { %19 = vsyncpa [#allocation4], 0 }
   0xb   :  { %21 = vsyncpa [#allocation4 + $0x1], 0 }
   0xc   :  { %22 = vsyncpa [#allocation13], 0 }
   0xd   :  { %24 = vsyncpa [#allocation13 + $0x1], 0  ;;  %s1389_s27 = smov 0   ;;  %s1391_s28 = smov 0  }
   0xe   :  { %s1393_s29 = smov 0   ;;  %s1395_s30 = smov 0  }
   0xf   :  { %s1397_s9 = smov 0   ;;  %s1399_s10 = smov 0  }
  0x10   :  { %s1401_s11 = smov 0   ;;  %s1403_s12 = smov 0  }
  0x11 LB: > { %1690 = sst [smem:[#allocation20_spill]] %s1307_s27  ;;  %s1430_s13 = sadd.s32 4294967295, %s1335_s12   ;;  %s1335_s12 = sphi %s1403_s12, %s30_s12   ;;  %s1331_s11 = sphi %s1401_s11, %s1720_s11   ;;  %s1327_s10 = sphi %s1399_s10, %s1719_s10   ;;  %s1323_s9 = sphi %s1397_s9, %s1718_s9   ;;  %s1319_s30 = sphi %s1395_s30, %s1717_s30   ;;  %s1315_s29 = sphi %s1393_s29, %s1716_s29   ;;  %s1311_s28 = sphi %s1391_s28, %s1715_s28   ;;  %s1307_s27 = sphi %s1389_s27, %s1714_s27  }
  0x12   : > { %p819_p0 = scmp.ge.s32.totalorder %s1335_s12, 1  ;;  %p65_p1 = scmp.eq.s32.totalorder %s1430_s13, 0 }
  0x13   : > { %p264_p2 = scmp.lt.s32.totalorder %s1335_s12, 5  ;;  %s1691_s1 = sld [smem:[#allocation25_spill]] }
  0x14   : > { %s1337_s18 = smov [#allocation5]   ;;  %s1694_s4 = sld [smem:[#allocation27_spill]] }
  0x15   : > { %p1438_p3 = pnand %p819_p0, %p264_p2  ;;  %s278_s19 = sshll.u32 %s1337_s18, 4  ;;  %s279_s19 = int_to_ptr.vmem [resolvable:$true] %s278_s19 }
  0x16   : > { %s1338_s24 = smov [#allocation8]   ;;  %s1695_s3 = sld [smem:[#allocation26_spill]] }
  0x17   : > { %p905_p4 = pneg %p1438_p3  ;;  %s306_s25 = sshll.u32 %s1338_s24, 4  ;;  %s307_s25 = int_to_ptr.vmem [resolvable:$true] %s306_s25 }
  0x18   : > { %s1339_s18 = smov 64   ;;  %s1340_s21 = smov 4  }
  0x19   : > { %s276_s16 = sshll.u32 %s1691_s1, 4  ;;  %p1446_p5 = pnand %p905_p4, %p65_p1  ;;  %s277_s16 = int_to_ptr.hbm [resolvable:$true] %s276_s16 }
  0x1a   : > { %s304_s23 = sshll.u32 %s1694_s4, 4  ;;  %s1696_s5 = sld [smem:[#allocation28_spill]]  ;;  %s305_s23 = int_to_ptr.hbm [resolvable:$true] %s304_s23 }
  0x1b   : > { %908 = dma.hbm_to_vmem [thread:$0]  (!%p1446_p5), %s277_s16, 16, %s279_s19, [#allocation6]  }
  0x1c   : > { %s290_s15 = sshll.u32 %s1695_s3, 4  ;;  %s1341_s19 = smov [#allocation7]   ;;  %s291_s15 = int_to_ptr.hbm [resolvable:$true] %s290_s15 }
  0x1d   : > { %914 = dma.hbm_to_vmem [thread:$0]  (!%p1446_p5), %s305_s23, 256, %s307_s25, [#allocation9], %s1339_s18, %s1339_s18, %s1340_s21  }
  0x1e   : > { %s292_s24 = sshll.u32 %s1341_s19, 4  ;;  %s1342_s26 = smov [#allocation10]   ;;  %s293_s24 = int_to_ptr.vmem [resolvable:$true] %s292_s24 }
  0x1f   : > { %911 = dma.hbm_to_vmem [thread:$0]  (!%p1446_p5), %s291_s15, 256, %s293_s24, [#allocation6], %s1339_s18, %s1339_s18, %s1340_s21  }
  0x20   : > { %s318_s16 = sshll.u32 %s1696_s5, 4  ;;  %s320_s14 = sshll.u32 %s1342_s26, 4  ;;  %s319_s16 = int_to_ptr.hbm [resolvable:$true] %s318_s16  ;;  %s321_s14 = int_to_ptr.vmem [resolvable:$true] %s320_s14 }
  0x21   : > { %917 = dma.hbm_to_vmem [thread:$0]  (!%p1446_p5), %s319_s16, 256, %s321_s14, [#allocation9], %s1339_s18, %s1339_s18, %s1340_s21  }
  0x22   : > { %s1680_s1 = sadd.s32 4294967294, %s1335_s12   ;;  %s39_s23 = sadd.s32 1, %s1327_s10 }
  0x23   : > { %p40_p6 = scmp.ge.s32.totalorder %s39_s23, 2  ;;  %s42_s25 = sadd.s32 1, %s1331_s11 }
  0x24   : > { %s51_s22 = sadd.s32 1, %s1315_s29  ;;  %p58_p7 = scmp.ne.s32.totalorder %s1315_s29, %s1311_s28 }
  0x25   : > { %s1722_s23 = smov (%p40_p6, %s39_s23), 0  ;;  %s1724_s25 = smov (!%p40_p6, %s42_s25), %s1331_s11 }
  0x26   : > { %1697 = sst [smem:[#allocation21_spill]] %s1722_s23  ;;  %s47_s15 = ssub.s32 %s1327_s10, %s1722_s23 }
  0x27   : > { %p59_p8 = scmp.eq.s32.totalorder %s1335_s12, 0  ;;  %p44_p9 = scmp.ge.s32.totalorder %s1724_s25, 2 }
  0x28   : > { %p64_p10 = scmp.ne.s32.totalorder %s1311_s28, %s1307_s27  ;;  %p195_p12 = scmp.eq.s32.totalorder %s1430_s13, 3 }
  0x29   : > { %p1481_p11 = por %p59_p8, %p58_p7  ;;  %s1726_s25 = smov (%p44_p9, %s1724_s25), 0 }
  0x2a   : > { %1699 = sst [smem:[#allocation22_spill]] %s1726_s25  ;;  %p1490_p13 = por %p65_p1, %p64_p10 }
  0x2b   : > { %p1494_p0 = por %p195_p12, %p58_p7  ;;  %s46_s16 = ssub.s32 %s1331_s11, %s1726_s25 }
  0x2c   : > { %p201_p2 = scmp.eq.s32.totalorder %s1680_s1, 3  ;;  %s48_s19 = sor.u32 %s47_s15, %s46_s16 }
  0x2d   : > { %s1701_s21 = scalar_select %p1494_p0, 1, 0 }
  0x2e   : > { %p936_p4 = scmp.lt.s32.totalorder %s1335_s12, 4  ;;  %p49_p5 = scmp.eq.s32.totalorder %s48_s19, 0 }
  0x2f   : > { %1702 = sst [smem:[#allocation23_spill]] %s1701_s21  ;;  %p1503_p6 = por %p201_p2, %p64_p10 }
  0x30   : > { %s334_s26 = sand.u32 1, %s1315_s29   ;;  %s826_s14 = sshll.u32 %s1331_s11, 1 }
  0x31   : > { %s1510_s3 = scalar_select %p49_p5, %s1315_s29, %s51_s22  }
  0x32   : > { %s825_s4 = sshll.u32 %s334_s26, 3  ;;  %s342_s5 = sadd.s32 %s1327_s10, %s826_s14 }
  0x33   : > { %s827_s23 = sshll.u32 %s342_s5, 3  ;;  %s338_s27 = scalar_lea.vmem [#allocation2], %s825_s4 }
  0x34   : > { %s348_s25 = sshll.u32 %s338_s27, 4  ;;  %s344_s21 = scalar_lea.hbm %s1667_s0, %s827_s23  ;;  %s349_s25 = int_to_ptr.vmem [resolvable:$true] %s348_s25 }
  0x35   : > { %s346_s15 = sshll.u32 %s344_s21, 4  ;;  %p919_p7 = pnand %p936_p4, %p1481_p11  ;;  %s347_s15 = int_to_ptr.hbm [resolvable:$true] %s346_s15 }
  0x36   : > { %s335_s16 = scalar_lea.sflag [#allocation3], %s334_s26  ;;  %357 = sbr.rel (%p1438_p3) target bundleno = 498 (0x1f2), region = 44 }
  0x37   : > { %921 = dma.hbm_to_vmem [thread:$0]  (!%p919_p7), %s347_s15, 128, %s349_s25, %s335_s16  }
  0x3b   : > { %s1523_s5 = sand.u32 1, %s1311_s28  }
  0x3c   : > { %s829_s4 = sshll.u32 %s1523_s5, 3  ;;  %s360_s8 = scalar_lea.sflag [#allocation3], %s1523_s5 }
  0x3d   : > { %s363_s27 = scalar_lea.vmem [#allocation2], %s829_s4 }
  0x3e   : > { %1286 = dma.done.wait (%p1490_p13), %s360_s8, 128  }
  0x3f   : > { %1288 = vsyncadd (%p1490_p13), %s360_s8, 4294967168 }
  0x40   : > { %1290 = dma.done.wait (%p65_p1), [#allocation6], 272  }
  0x41   : > { %1292 = vsyncadd (%p65_p1), [#allocation6], 4294967024 }
  0x42   : > { %1294 = dma.done.wait (%p65_p1), [#allocation9], 512  }
  0x43   : > { %1296 = vsyncadd (%p65_p1), [#allocation9], 4294966784  ;;  %vm431_vm0 = vcmask 261120   ;;  %v428_v0 = vld [vmem:[%s363_s27] sm:$0xff]  ;;  %v1343_v2 = vmov 32.0   ;;  %v875_v17 = vld [vmem:[#allocation7] sm:$0xff] }
  0x44   : > { %v432_v1 = vsel %vm431_vm0, %v428_v0, 0.0  ;;  %1015 = vrcp.f32 %v1343_v2  ;;  %v876_v14 = vld [vmem:[#allocation7 + $0x8] sm:$0xff]  ;;  %v878_v15 = vld [vmem:[#allocation8 + $0x8] sm:$0xff]  ;;  %v877_v18 = vld [vmem:[#allocation8] sm:$0xff]  ;;  %s867_s23 = sshll.u32 %s1323_s9, 1  ;;  %s1550_s20 = sshll.u32 %s1523_s5, 2 }
  0x45   : > { %433 = vadd.xlane.f32.xlu0 %v432_v1  ;;  %v880_v16 = vld [vmem:[#allocation10 + $0x8] sm:$0xff]  ;;  %495 = vmatpush.bf16.msra.mxu0 %v876_v14  ;;  %v879_v19 = vld [vmem:[#allocation10] sm:$0xff]  ;;  %v1013_v29 = vld [vmem:[#allocation5] ss:$0 sm:$0xff]  ;;  %s588_s25 = sadd.s32 %s1319_s30, %s867_s23  ;;  %s572_s26 = sand.u32 1, %s1430_s13   ;;  %vm503_vm5 = vcmask 257024  }
  0x46   : > { %527 = vmatpush.bf16.msra.mxu1 %v878_v15  ;;  %558 = vmatpush.bf16.msra.mxu2 %v880_v16  ;;  %v1014_v32 = vld [vmem:[%s1669_s2] ss:$0 sm:$0xff]  ;;  %s868_s22 = sshll.u32 %s588_s25, 2  ;;  %s419_s14 = scalar_lea.vmem [#allocation12], %s1550_s20 }
  0x47   : > { %s606_s19 = scalar_lea.hbm %s1674_s7, %s868_s22  ;;  %s1557_s15 = sshll.u32 %s419_s14, 4  ;;  %s609_s15 = int_to_ptr.vmem [resolvable:$true] %s1557_s15 }
  0x48   : > { %s590_s9 = scalar_lea.hbm %s1673_s6, %s868_s22  ;;  %s1562_s30 = sshll.u32 %s606_s19, 4  ;;  %s611_s30 = int_to_ptr.hbm [resolvable:$true] %s1562_s30 }
  0x49   : > { %496 = vmatpush.bf16.msra.mxu0 %v875_v17  ;;  %s1683_s8 = scalar_lea.vmem [#allocation11], %s1550_s20  ;;  %s1570_s13 = sshll.u32 %s590_s9, 4  ;;  %s595_s13 = int_to_ptr.hbm [resolvable:$true] %s1570_s13 }
  0x4a   : > { %v1016_v3 = vpop.eup %1015  ;;  %528 = vmatpush.bf16.msra.mxu1 %v877_v18  ;;  %559 = vmatpush.bf16.msra.mxu2 %v879_v19  ;;  %s1567_s27 = sshll.u32 %s1683_s8, 4  ;;  %s1706_s25 = sld [smem:[#allocation29_spill]] }
  0x4b   : > { %v436_v4 = vmul.f32 32.0, %v1016_v3  ;;  %vm440_vm1 = vweird.f32 %v1016_v3  ;;  %1704 = sst [smem:[#allocation24_spill]] %s1567_s27  ;;  %s426_s21 = scalar_lea.vmem [#allocation14], %s1550_s20 }
  0x4c   : > { %s1582_s19 = sshll.u32 %s426_s21, 4  ;;  %s1586_s4 = scalar_lea.sflag [#allocation13], %s572_s26  ;;  %s625_s19 = int_to_ptr.vmem [resolvable:$true] %s1582_s19 }
  0x4d   : > { %v437_v5 = vsub.f32 1.0, %v436_v4  ;;  %s1183_s9 = sshra.s32 %s611_s30, 4  ;;  %s1189_s23 = scalar_lea.hbm %s1674_s7, 16  ;;  %s1184_s9 = int_to_ptr.hbm [resolvable:$true] %s1183_s9 }
  0x4e   : > { %s1185_s8 = scalar_lea.hbm %s1184_s9, 4  ;;  %p1190_p9 = scmp.lt.s32.totalorder %s1184_s9, %s1674_s7 }
  0x4f   : > { %v438_v6 = vmul.f32 %v1016_v3, %v437_v5  ;;  %p1186_p1 = scmp.ne.s32.totalorder %s1184_s9, %s1185_s8  ;;  %p1191_p10 = scmp.lt.s32.totalorder %s1189_s23, %s1185_s8 }
  0x50   : > { %s622_s18 = scalar_lea.hbm %s1706_s25, %s868_s22 }
  0x51   : > { %v439_v7 = vadd.f32 %v1016_v3, %v438_v6  ;;  %s1584_s16 = sshll.u32 %s622_s18, 4  ;;  %p1187_p3 = pnand %p1186_p1, %p1494_p0  ;;  %s627_s16 = int_to_ptr.hbm [resolvable:$true] %s1584_s16 }
  0x52   : > { %p1192_p11 = por %p1191_p10, %p1190_p9 }
  0x53   : > { %v441_v8 = vsel %vm440_vm1, %v1016_v3, %v439_v7  ;;  %p1188_p8 = pneg %p1187_p3 }
  0x55   : > { %p1193_p12 = pnand %p1192_p11, %p1188_p8 }
  0xb8   : > { %v434_v9 = vpop.xlane.xlu0 %433 }
  0xb9   : > { %v442_v10 = vmul.f32 %v441_v8, %v434_v9 }
  0xbb   : > { %v443_v11 = vsub.f32 %v428_v0, %v442_v10 }
  0xbd   : > { %v444_v12 = vmul.f32 %v443_v11, %v443_v11 }
  0xbf   : > { %v445_v13 = vsel %vm431_vm0, %v444_v12, 0.0 }
  0xc0   : > { %446 = vadd.xlane.f32.xlu0 %v445_v13 }
 0x133   : > { %v447_v20 = vpop.xlane.xlu0 %446 }
 0x134   : > { %v448_v21 = vmul.f32 %v447_v20, %v441_v8 }
 0x136   : > { %v449_v22 = vadd.f32 1e-05, %v448_v21 }
 0x138   : > { %1017 = vrsqrt.f32 %v449_v22  ;;  %vm456_vm3 = vweird.f32 %v449_v22 }
 0x13e   : > { %v1018_v23 = vpop.eup %1017 }
 0x13f   : > { %v451_v24 = vmul.f32 %v1018_v23, %v449_v22  ;;  %vm457_vm2 = vweird.f32 %v1018_v23 }
 0x140   : > { %vm458_vm4 = vmor %vm456_vm3, %vm457_vm2 }
 0x141   : > { %v452_v25 = vmul.f32 %v1018_v23, %v451_v24 }
 0x143   : > { %v453_v26 = vmul.f32 0.5, %v452_v25 }
 0x145   : > { %v454_v27 = vsub.f32 1.5, %v453_v26 }
 0x147   : > { %v455_v28 = vmul.f32 %v1018_v23, %v454_v27 }
 0x149   : > { %v459_v30 = vsel %vm458_vm4, %v1018_v23, %v455_v28 }
 0x14a   : > { %v460_v31 = vmul.f32 %v459_v30, %v443_v11 }
 0x14c   : > { %v464_v33 = vmul.f32 %v1013_v29, %v460_v31 }
 0x14e   : > { %v468_v34 = vadd.f32 %v1014_v32, %v464_v33 }
 0x150   : > { %v469_v35 = vpack.c.bf16 %v468_v34, %v468_v34 }
 0x152   : > { %845 = vmatmul.msk.bf16.vlgmr.msra.gmra.mxu0 %vm431_vm0, %v469_v35  ;;  %854 = vmatmul.msk.bf16.vlgmr.msra.gmra.mxu1 %vm431_vm0, %v469_v35 }
 0x153   : > { %863 = vmatmul.msk.bf16.vlgmr.msra.gmra.mxu2 %vm431_vm0, %v469_v35 }
 0x1cf   : > { %v498_v36 = vpop.f32.mrf.mxu0  ;;  %v530_v37 = vpop.f32.mrf.mxu1 }
 0x1d0   : > { %v502_v38 = vpack.c.bf16 %v498_v36, %v498_v36  ;;  %v534_v39 = vpack.c.bf16 %v530_v37, %v530_v37 }
 0x1d2   : > { %535 = vst.msk [vmem:[%s419_s14] sm:$0xf] %vm503_vm5, %v534_v39 }
 0x1d3   : > { %1196 = shalt.err (!%p1193_p12)
}
 0x1d4   : > { %900 = dma.vmem_to_hbm [thread:$0]  (%p1494_p0), %s609_s15, 64, %s611_s30, %s1586_s4  }
 0x1d5   : > { %s1707_s26 = scalar_lea.vmem [#allocation11], %s1550_s20  ;;  %s568_s18 = scalar_lea.sflag [#allocation4], %s1523_s5 }
 0x1d6   : > { %504 = vst.msk [vmem:[%s1707_s26] sm:$0xf] %vm503_vm5, %v502_v38  ;;  %s1211_s27 = sshra.s32 %s595_s13, 4  ;;  %s1217_s1 = scalar_lea.hbm %s1673_s6, 16  ;;  %s1212_s27 = int_to_ptr.hbm [resolvable:$true] %s1211_s27 }
 0x1d7   : > { %s1213_s8 = scalar_lea.hbm %s1212_s27, 4  ;;  %p1218_p5 = scmp.lt.s32.totalorder %s1212_s27, %s1673_s6 }
 0x1d8   : > { %p1214_p13 = scmp.ne.s32.totalorder %s1212_s27, %s1213_s8  ;;  %p1219_p7 = scmp.lt.s32.totalorder %s1217_s1, %s1213_s8 }
 0x1da   : > { %p1215_p2 = pnand %p1214_p13, %p1494_p0  ;;  %p1220_p1 = por %p1219_p7, %p1218_p5 }
 0x1dc   : > { %p1216_p4 = pneg %p1215_p2 }
 0x1de   : > { %p1221_p3 = pnand %p1220_p1, %p1216_p4 }
 0x1e0   : > { %1224 = shalt.err (!%p1221_p3)
}
 0x1e1   : > { %s1708_s5 = sld [smem:[#allocation24_spill]]  ;;  %v561_v40 = vpop.f32.mrf.mxu2  ;;  %v500_v42 = vpop.f32.mrf.mxu0  ;;  %s1239_s30 = sshra.s32 %s627_s16, 4  ;;  %s1240_s30 = int_to_ptr.hbm [resolvable:$true] %s1239_s30 }
 0x1e2   : > { %v565_v41 = vpack.c.bf16 %v561_v40, %v561_v40  ;;  %v532_v43 = vpop.f32.mrf.mxu1  ;;  %s1241_s26 = scalar_lea.hbm %s1240_s30, 4  ;;  %p1246_p11 = scmp.lt.s32.totalorder %s1240_s30, %s1706_s25 }
 0x1e3   : > { %p1242_p8 = scmp.ne.s32.totalorder %s1240_s30, %s1241_s26 }
 0x1e4   : > { %566 = vst.msk [vmem:[%s426_s21] sm:$0xf] %vm503_vm5, %v565_v41 }
 0x1e5   : > { %p1243_p9 = pnand %p1242_p8, %p1494_p0 }
 0x1e7   : > { %s1709_s15 = int_to_ptr.vmem [resolvable:$true] %s1708_s5  ;;  %p1244_p10 = pneg %p1243_p9 }
 0x1e8   : > { %899 = dma.vmem_to_hbm [thread:$0]  (%p1494_p0), %s1709_s15, 64, %s595_s13, %s568_s18  }
 0x1e9   : > { %s1245_s13 = scalar_lea.hbm %s1706_s25, 16 }
 0x1ea   : > { %p1247_p12 = scmp.lt.s32.totalorder %s1245_s13, %s1241_s26 }
 0x1ec   : > { %p1248_p13 = por %p1247_p12, %p1246_p11 }
 0x1ee   : > { %p1249_p2 = pnand %p1248_p13, %p1244_p10 }
 0x1f0   : > { %1252 = shalt.err (!%p1249_p2)
}
 0x1f1   : > { %901 = dma.vmem_to_hbm [thread:$0]  (%p1494_p0), %s625_s19, 64, %s627_s16, %s1586_s4   ;;  %v563_v44 = vpop.f32.mrf.mxu2 }
 0x1f2 PF: > { %s1710_s20 = sld [smem:[#allocation20_spill]]  ;;  %p941_p4 = scmp.ge.s32.totalorder %s1335_s12, 2 }
 0x1f4   : > { %p923_p5 = pnand %p941_p4, %p1503_p6 }
 0x1f6   : > { %p924_p7 = pneg %p923_p5 }
 0x1f8   : > { %s638_s21 = sand.u32 1, %s1710_s20  }
 0x1f9   : > { %s639_s22 = scalar_lea.sflag [#allocation4], %s638_s21 }
 0x1fa   : > { %1298 = dma.done.wait (%p924_p7), %s639_s22, 64  }
 0x1fb   : > { %1300 = vsyncadd (%p924_p7), %s639_s22, 4294967232  ;;  %s1711_s1 = sadd.s32 4294967294, %s1335_s12  }
 0x1fc   : > { %s648_s23 = sand.u32 1, %s1711_s1  }
 0x1fd   : > { %s649_s14 = scalar_lea.sflag [#allocation13], %s648_s23 }
 0x1fe   : > { %1302 = dma.done.wait (%p924_p7), %s649_s14, 128  }
 0x1ff   : > { %1304 = vsyncadd (%p924_p7), %s649_s14, 4294967168  ;;  %s30_s12 = sadd.s32 1, %s1335_s12   ;;  %s1712_s24 = sld [smem:[#allocation21_spill]] }
 0x200   : > { %p27_p0 = scmp.ge.s32.totalorder %s30_s12, 6   ;;  %s1713_s17 = sld [smem:[#allocation22_spill]] }
 0x201   : > { %s1714_s27 = smov %s1311_s28  ;;  %s1715_s28 = smov %s1315_s29 }
 0x202   : > { %s1716_s29 = smov %s1510_s3  ;;  %s1717_s30 = smov %s1327_s10 }
 0x203   : > { %s1718_s9 = smov %s1331_s11  ;;  %29 = sbr.rel (!%p27_p0) target bundleno = 17 (0x11), region = 137 }
 0x205   : > { %s1719_s10 = smov %s1712_s24 }
 0x206   : > { %s1720_s11 = smov %s1713_s17 }
 0x208   :  { %665 = vsyncpa [#allocation3], 1 }
 0x209   :  { %667 = vsyncpa [#allocation3 + $0x1], 1 }
 0x20a   :  { %668 = vsyncpa [#allocation6], 1 }
 0x20b   :  { %669 = vsyncpa [#allocation9], 1 }
 0x20c   :  { %670 = vsyncpa [#allocation4], 1 }
 0x20d   :  { %672 = vsyncpa [#allocation4 + $0x1], 1 }
 0x20e   :  { %673 = vsyncpa [#allocation13], 1 }
 0x20f   :  { %675 = vsyncpa [#allocation13 + $0x1], 1 }

</bundles_post_ra>
